<compile_context>
chip_gen: v7x
topology: tpu7x:2x2x1
jax: 0.10.0
libtpu: 0.0.40
codegen_flags: <defaults>
</compile_context>

<pallas_src>
import functools

import jax
import jax.numpy as jnp
from jax.experimental import pallas as pl
from jax.experimental.pallas import tpu as pltpu


# ---------------------------------------------------------------------------
# Helpers
# ---------------------------------------------------------------------------
def _round_up(x, m):
    return ((x + m - 1) // m) * m


def _pad_feature(n):
    """Pad feature dims so matmul tiles are lane-dense and 256-aligned where
    it matters for the 256x256 MXUs on v6e/v7x (128 stays fine for v5e)."""
    if n <= 128:
        return 128
    if n <= 512:
        return _round_up(n, 256)
    return _round_up(n, 512)


def _padded_rows(n):
    """Row (M / sublane) padding: >=16 rows; 256-multiples for large batches
    so both the matmul row tiles and the latent row grid divide evenly."""
    if n <= 128:
        return _round_up(max(n, 8), 16)
    return _round_up(n, 256)


def _pick_tile(dim, candidates):
    for c in candidates:
        if dim % c == 0:
            return c
    return dim


def _nbytes(a):
    return int(a.size) * jnp.dtype(a.dtype).itemsize


_MIB = 1024 * 1024


def _vmem_limit(buf_bytes):
    # Generous headroom over the estimated double-buffered footprint, but
    # never above v7x's 64 MiB physical VMEM.
    return int(min(max(2 * buf_bytes, 32 * _MIB), 64 * _MIB))


# ---------------------------------------------------------------------------
# Kernel 1/3 and 3/3: tiled linear  y = act(x @ W + b)
#   bf16 inputs on the MXU, fp32 accumulation.
# ---------------------------------------------------------------------------
def _linear_kernel_nok(x_ref, w_ref, b_ref, o_ref, *, activation):
    # Single K tile: no reduction axis, no accumulator scratch.
    y = jnp.dot(x_ref[...].astype(jnp.bfloat16), w_ref[...],
                preferred_element_type=jnp.float32) + b_ref[...]
    if activation == "relu":
        y = jnp.maximum(y, 0.0)
    elif activation == "sigmoid":
        y = jax.nn.sigmoid(y)
    o_ref[...] = y.astype(o_ref.dtype)


def _linear_kernel_k(x_ref, w_ref, b_ref, o_ref, acc_ref, *, activation):
    k = pl.program_id(2)

    @pl.when(k == 0)
    def _():
        acc_ref[...] = jnp.zeros_like(acc_ref)

    acc_ref[...] += jnp.dot(x_ref[...].astype(jnp.bfloat16), w_ref[...],
                            preferred_element_type=jnp.float32)

    @pl.when(k == pl.num_programs(2) - 1)
    def _():
        y = acc_ref[...] + b_ref[...]
        if activation == "relu":
            y = jnp.maximum(y, 0.0)
        elif activation == "sigmoid":
            y = jax.nn.sigmoid(y)
        o_ref[...] = y.astype(o_ref.dtype)


def tiled_linear(x, w_p, b_p, *, activation=None, out_dtype=jnp.float32,
                 tm_max=512, tn_max=1024, tk_max=1024):
    """x: (M, K<=Kp) float (ideally bf16, pre-padded); w_p: (Kp, Np) bf16
    pre-padded; b_p: (1, Np) f32.  Returns the PADDED (Mp, Np) output."""
    M, K = x.shape
    Kp, Np_ = w_p.shape
    assert b_p.shape == (1, Np_)

    if M <= 128:
        Mp = _round_up(max(M, 8), 16)
        tm = Mp
    else:
        Mp = _round_up(M, 256)
        tm = _pick_tile(Mp, (tm_max, 256))
    tn = _pick_tile(Np_, (tn_max, 512, 256, 128))
    tk = _pick_tile(Kp, (tk_max, 512, 256, 128))

    if M != Mp or K != Kp:
        x = jnp.pad(x, ((0, Mp - M), (0, Kp - K)))

    n_k = Kp // tk
    x_b = jnp.dtype(x.dtype).itemsize
    o_b = jnp.dtype(out_dtype).itemsize
    flops = 2 * Mp * Kp * Np_
    bytes_accessed = Mp * Kp * x_b + Kp * Np_ * 2 + Mp * Np_ * o_b
    buf_bytes = 2 * (tm * tk * x_b + tk * tn * 2 + tn * 4 + tm * tn * o_b)

    if n_k == 1:
        grid = (Mp // tm, Np_ // tn)
        kern = functools.partial(_linear_kernel_nok, activation=activation)
        grid_spec = pltpu.PrefetchScalarGridSpec(
            num_scalar_prefetch=0,
            grid=grid,
            in_specs=[pl.BlockSpec((tm, tk), lambda i, j: (i, 0)),
                      pl.BlockSpec((tk, tn), lambda i, j: (0, j)),
                      pl.BlockSpec((1, tn), lambda i, j: (0, j))],
            out_specs=pl.BlockSpec((tm, tn), lambda i, j: (i, j)))
        semantics = ("parallel", "parallel")
    else:
        buf_bytes += tm * tn * 4
        grid = (Mp // tm, Np_ // tn, n_k)
        kern = functools.partial(_linear_kernel_k, activation=activation)
        # TODO(synk): on v5e, pipeline_mode=pl.Buffered(3) on the weight spec
        # could hide more of the dominant weight stream if still DMA-exposed.
        grid_spec = pltpu.PrefetchScalarGridSpec(
            num_scalar_prefetch=0,
            grid=grid,
            in_specs=[pl.BlockSpec((tm, tk), lambda i, j, k: (i, k)),
                      pl.BlockSpec((tk, tn), lambda i, j, k: (k, j)),
                      pl.BlockSpec((1, tn), lambda i, j, k: (0, j))],
            out_specs=pl.BlockSpec((tm, tn), lambda i, j, k: (i, j)),
            scratch_shapes=[pltpu.VMEM((tm, tn), jnp.float32)])
        semantics = ("parallel", "parallel", "arbitrary")

    return pl.pallas_call(
        kern,
        out_shape=jax.ShapeDtypeStruct((Mp, Np_), out_dtype),
        grid_spec=grid_spec,
        compiler_params=pltpu.CompilerParams(
            dimension_semantics=semantics,
            vmem_limit_bytes=_vmem_limit(buf_bytes)),
        cost_estimate=pl.CostEstimate(flops=int(flops), transcendentals=0,
                                      bytes_accessed=int(bytes_accessed)),
    )(x, w_p, b_p)


# ---------------------------------------------------------------------------
# Kernel 2/3: fused latent path, gridded over batch-row blocks
#   mu/logvar (one concatenated matmul) -> reparameterize -> KLD
#   -> latent_to_dms MLP (+ optional sigmoid) -> first decoder layer
# Outputs: lane-dense fp32 slab [mu | logvar | z | KLD | y_hat], bf16 h_dec.
# ---------------------------------------------------------------------------
def _latent_kernel(h_ref, eps_ref, wmv_ref, bmv_ref, wd1_ref, bd1_ref,
                   wd2_ref, bd2_ref, wdec1_ref, bdec1_ref,
                   slab_ref, hdec_ref, *, zp, stochastic, sigmoid):
    h = h_ref[...].astype(jnp.bfloat16)

    muvar = jnp.dot(h, wmv_ref[...],
                    preferred_element_type=jnp.float32) + bmv_ref[...]
    mu = muvar[:, :zp]
    logvar = muvar[:, zp:]

    # Single exp over the (rows, ZP) block; exp(logvar) = std*std afterwards
    # (halves EUP transcendental count; the extra multiply rides on VALU).
    std = jnp.exp(0.5 * logvar)
    if stochastic:
        z = mu + std * eps_ref[...]
    else:
        z = mu

    # KLD per sample; padded latent columns contribute exactly zero
    # (mu=0, logvar=0, std=1 -> 1 + 0 - 0 - 1 = 0).
    kld = -0.5 * jnp.sum(1.0 + logvar - mu * mu - std * std,
                         axis=-1, keepdims=True)

    # latent_to_dms head (detach is identity in a forward pass)
    h_dms = jnp.maximum(
        jnp.dot(mu.astype(jnp.bfloat16), wd1_ref[...],
                preferred_element_type=jnp.float32) + bd1_ref[...], 0.0)
    y = jnp.dot(h_dms.astype(jnp.bfloat16), wd2_ref[...],
                preferred_element_type=jnp.float32) + bd2_ref[...]
    if sigmoid:
        y = jax.nn.sigmoid(y)

    # first decoder layer
    h_dec = jnp.maximum(
        jnp.dot(z.astype(jnp.bfloat16), wdec1_ref[...],
                preferred_element_type=jnp.float32) + bdec1_ref[...], 0.0)

    # Direct lane-dense column-slice stores (all offsets are 128-multiples),
    # no full-width concatenate temporary.
    slab_ref[:, 0:2 * zp] = muvar
    slab_ref[:, 2 * zp:3 * zp] = z
    slab_ref[:, 3 * zp:3 * zp + 128] = jnp.broadcast_to(
        kld, (kld.shape[0], 128))
    slab_ref[:, 3 * zp + 128:] = y
    hdec_ref[...] = h_dec.astype(hdec_ref.dtype)


def fused_latent(h_enc, eps_p, pp, *, zp, stochastic, sigmoid, row_tile=256):
    NP, ehp = h_enc.shape
    dhp = pp["W_dec1_p"].shape[1]
    dmshp = pp["W_dms1_p"].shape[1]
    dmsop = pp["W_dms2_p"].shape[1]
    slab_w = 3 * zp + 128 + dmsop

    tm = NP if NP <= row_tile else row_tile
    assert NP % tm == 0
    grid = (NP // tm,)

    weights = (pp["W_muvar_p"], pp["b_muvar_p"],
               pp["W_dms1_p"], pp["b_dms1_p"],
               pp["W_dms2_p"], pp["b_dms2_p"],
               pp["W_dec1_p"], pp["b_dec1_p"])

    def rows(cols):
        return pl.BlockSpec((tm, cols), lambda i: (i, 0))

    def whole(arr):
        return pl.BlockSpec(arr.shape, lambda i: (0, 0))

    w_bytes = sum(_nbytes(a) for a in weights)
    act_bytes = 2 * (tm * ehp * 2 + tm * zp * 4
                     + tm * slab_w * 4 + tm * dhp * 2)
    buf_bytes = 2 * w_bytes + act_bytes
    flops = 2 * NP * (ehp * 2 * zp + zp * dmshp + dmshp * dmsop + zp * dhp)
    bytes_accessed = (NP * ehp * 2 + NP * zp * 4 + w_bytes
                      + NP * slab_w * 4 + NP * dhp * 2)

    kern = functools.partial(_latent_kernel, zp=zp,
                             stochastic=stochastic, sigmoid=sigmoid)
    slab, h_dec = pl.pallas_call(
        kern,
        out_shape=(jax.ShapeDtypeStruct((NP, slab_w), jnp.float32),
                   jax.ShapeDtypeStruct((NP, dhp), jnp.bfloat16)),
        grid_spec=pltpu.PrefetchScalarGridSpec(
            num_scalar_prefetch=0,
            grid=grid,
            in_specs=[rows(ehp), rows(zp)] + [whole(a) for a in weights],
            out_specs=(pl.BlockSpec((tm, slab_w), lambda i: (i, 0)),
                       pl.BlockSpec((tm, dhp), lambda i: (i, 0)))),
        compiler_params=pltpu.CompilerParams(
            dimension_semantics=("parallel",),
            vmem_limit_bytes=_vmem_limit(buf_bytes)),
        cost_estimate=pl.CostEstimate(flops=int(flops),
                                      transcendentals=int(NP * (zp + dmsop)),
                                      bytes_accessed=int(bytes_accessed)),
    )(h_enc, eps_p, *weights)
    return slab, h_dec


# ---------------------------------------------------------------------------
# Parameter construction (deterministic, xavier-uniform-like) + prepare step
# ---------------------------------------------------------------------------
def _xavier(key, shape, gain=1.0):
    fan_in, fan_out = shape
    a = gain * (6.0 / (fan_in + fan_out)) ** 0.5
    return jax.random.uniform(key, shape, jnp.float32, -a, a)


def init_dms_eve_params(key, L, d, enc_hidden, z_dim, dms_hidden, dms_out,
                        dec_hidden):
    in_dim = L * d
    ks = jax.random.split(key, 16)
    params = {
        # matVAE encoder
        "W_enc": _xavier(ks[0], (in_dim, enc_hidden)),
        "b_enc": jnp.zeros((enc_hidden,), jnp.float32),
        "W_mu": _xavier(ks[1], (enc_hidden, z_dim)),
        "b_mu": jnp.zeros((z_dim,), jnp.float32),
        "W_logvar": _xavier(ks[2], (enc_hidden, z_dim)),
        "b_logvar": jnp.zeros((z_dim,), jnp.float32),
        # latent_to_dms MLP
        "W_dms1": _xavier(ks[3], (z_dim, dms_hidden)),
        "b_dms1": jnp.zeros((dms_hidden,), jnp.float32),
        "W_dms2": _xavier(ks[4], (dms_hidden, dms_out)),
        "b_dms2": jnp.zeros((dms_out,), jnp.float32),
        # matVAE decoder
        "W_dec1": _xavier(ks[5], (z_dim, dec_hidden)),
        "b_dec1": jnp.zeros((dec_hidden,), jnp.float32),
        "W_dec2": _xavier(ks[6], (dec_hidden, in_dim)),
        "b_dec2": jnp.zeros((in_dim,), jnp.float32),
    }
    # synthetic, deterministic stand-in for the (normalized) Grantham buffer
    g = jax.random.uniform(ks[7], (21, 21), jnp.float32)
    g = 0.5 * (g + g.T)
    g = g / jnp.max(g)
    g = g * (1.0 - jnp.eye(21, dtype=jnp.float32))
    params["grantham_matrix"] = g
    return params


def prepare_dms_eve_params(params, dims):
    """One-time: zero-pad to tile-friendly shapes and cast weights to bf16."""
    in_dim = dims["L"] * dims["d"]
    INP = _pad_feature(in_dim)
    EHP = _pad_feature(dims["enc_hidden"])
    DHP = _pad_feature(dims["dec_hidden"])
    ZP = _round_up(dims["z_dim"], 128)
    DMSHP = _round_up(dims["dms_hidden"], 128)
    DMSOP = _round_up(dims["dms_out"], 128)

    def pw(w, rows, cols):
        return jnp.pad(w, ((0, rows - w.shape[0]),
                           (0, cols - w.shape[1]))).astype(jnp.bfloat16)

    def pb(b, cols):
        return jnp.pad(b, (0, cols - b.shape[0])).astype(
            jnp.float32).reshape(1, cols)

    w_mu = pw(params["W_mu"], EHP, ZP)
    w_lv = pw(params["W_logvar"], EHP, ZP)
    return {
        "W_enc_p": pw(params["W_enc"], INP, EHP),
        "b_enc_p": pb(params["b_enc"], EHP),
        "W_muvar_p": jnp.concatenate([w_mu, w_lv], axis=1),
        "b_muvar_p": jnp.concatenate([pb(params["b_mu"], ZP),
                                      pb(params["b_logvar"], ZP)], axis=1),
        "W_dms1_p": pw(params["W_dms1"], ZP, DMSHP),
        "b_dms1_p": pb(params["b_dms1"], DMSHP),
        "W_dms2_p": pw(params["W_dms2"], DMSHP, DMSOP),
        "b_dms2_p": pb(params["b_dms2"], DMSOP),
        "W_dec1_p": pw(params["W_dec1"], ZP, DHP),
        "b_dec1_p": pb(params["b_dec1"], DHP),
        "W_dec2_p": pw(params["W_dec2"], DHP, INP),
        "b_dec2_p": pb(params["b_dec2"], INP),
        "grantham_matrix": params["grantham_matrix"],
    }


# ---------------------------------------------------------------------------
# dmsEVE.forward
# ---------------------------------------------------------------------------
def build_dms_eve_forward(dims, *, stochastic_latent=True,
                          latent_to_dms_sigmoid=True,
                          latent_to_dms_detach=True):
    L, d = dims["L"], dims["d"]
    in_dim = L * d
    z_dim, dms_out = dims["z_dim"], dims["dms_out"]
    INP = _pad_feature(in_dim)
    ZP = _round_up(z_dim, 128)

    def forward(pparams, x, eps):
        N = x.shape[0]
        NP = _padded_rows(N)
        # cast to bf16 once upstream (halves re-streamed x traffic, removes
        # the per-step VPU pack in the matmul kernel)
        x_flat = x.reshape(N, in_dim).astype(jnp.bfloat16)
        x_p = jnp.pad(x_flat, ((0, NP - N), (0, INP - in_dim)))
        eps_p = jnp.pad(eps.astype(jnp.float32),
                        ((0, NP - N), (0, ZP - z_dim)))

        # (1) encoder hidden layer (tiled matmul on MXU)
        h_enc = tiled_linear(x_p, pparams["W_enc_p"], pparams["b_enc_p"],
                             activation="relu", out_dtype=jnp.bfloat16)

        # (2) fused latent path: mu/logvar, reparam, KLD, DMS head, dec layer 1
        slab, h_dec = fused_latent(h_enc, eps_p, pparams, zp=ZP,
                                   stochastic=stochastic_latent,
                                   sigmoid=latent_to_dms_sigmoid)

        # (3) decoder output layer (tiled matmul on MXU)
        logits_p = tiled_linear(h_dec, pparams["W_dec2_p"],
                                pparams["b_dec2_p"],
                                activation=None, out_dtype=jnp.float32)
        logits = logits_p[:N, :in_dim].reshape(N, L, d)

        mu = slab[:N, 0:z_dim]
        logvar = slab[:N, ZP:ZP + z_dim]
        z = slab[:N, 2 * ZP:2 * ZP + z_dim]
        kld = slab[:N, 3 * ZP]
        y_hat_dms = slab[:N, 3 * ZP + 128:3 * ZP + 128 + dms_out]

        # TODO(synk): forward-only; detach/grad semantics are not reproduced.
        lat_in = jax.lax.stop_gradient(mu) if latent_to_dms_detach else mu
        latent_output = {
            "latent_to_dms_input": lat_in,
            "y_hat_dms": y_hat_dms,
            "KLD": kld,
            "z": z,
            "mu": mu,
            "logvar": logvar,
        }
        return logits, latent_output

    return jax.jit(forward)


# ---------------------------------------------------------------------------
# Pure-JAX reference (mirrors the bf16-weight / fp32-accum Pallas path)
# ---------------------------------------------------------------------------
def _bf16(x):
    return x.astype(jnp.bfloat16)


def _reference_forward(params, x, eps):
    N, L, d = x.shape
    xf = x.reshape(N, L * d).astype(jnp.float32)
    dot = functools.partial(jnp.dot, preferred_element_type=jnp.float32)
    h_enc = jnp.maximum(dot(_bf16(xf), _bf16(params["W_enc"]))
                        + params["b_enc"], 0.0)
    h_enc = _bf16(h_enc)
    mu = dot(h_enc, _bf16(params["W_mu"])) + params["b_mu"]
    logvar = dot(h_enc, _bf16(params["W_logvar"])) + params["b_logvar"]
    z = mu + jnp.exp(0.5 * logvar) * eps
    kld = -0.5 * jnp.sum(1.0 + logvar - mu * mu - jnp.exp(logvar), axis=-1)
    h_dms = jnp.maximum(dot(_bf16(mu), _bf16(params["W_dms1"]))
                        + params["b_dms1"], 0.0)
    y = dot(_bf16(h_dms), _bf16(params["W_dms2"])) + params["b_dms2"]
    y = jax.nn.sigmoid(y)
    h_dec = jnp.maximum(dot(_bf16(z), _bf16(params["W_dec1"]))
                        + params["b_dec1"], 0.0)
    logits = dot(_bf16(h_dec), _bf16(params["W_dec2"])) + params["b_dec2"]
    return logits.reshape(N, L, d), {"mu": mu, "logvar": logvar, "z": z,
                                     "KLD": kld, "y_hat_dms": y}


# ---------------------------------------------------------------------------
if __name__ == "__main__":
    # Small shapes consistent with dmsEVE's (N, L, d) input convention.
    N, L, d = 2, 8, 4
    dims = dict(L=L, d=d, enc_hidden=32, z_dim=16, dms_hidden=16,
                dms_out=1, dec_hidden=32)

    key = jax.random.PRNGKey(0)
    k_param, k_x, k_eps = jax.random.split(key, 3)

    params = init_dms_eve_params(k_param, **dims)
    pparams = prepare_dms_eve_params(params, dims)

    x = jax.random.normal(k_x, (N, L, d), jnp.float32)
    eps = jax.random.normal(k_eps, (N, dims["z_dim"]), jnp.float32)

    fwd = build_dms_eve_forward(dims, stochastic_latent=True,
                                latent_to_dms_sigmoid=True,
                                latent_to_dms_detach=True)
    logits, latent_output = fwd(pparams, x, eps)
    jax.block_until_ready(logits)
    jax.block_until_ready(latent_output["y_hat_dms"])
    jax.block_until_ready(latent_output["KLD"])

    assert logits.shape == (N, L, d)
    assert latent_output["y_hat_dms"].shape == (N, dims["dms_out"])
    assert latent_output["KLD"].shape == (N,)
    assert latent_output["mu"].shape == (N, dims["z_dim"])

    # numerical sanity check against a pure-JAX reference
    ref_logits, ref_lat = _reference_forward(params, x, eps)
    checks = [
        ("logits", logits, ref_logits),
        ("mu", latent_output["mu"], ref_lat["mu"]),
        ("logvar", latent_output["logvar"], ref_lat["logvar"]),
        ("z", latent_output["z"], ref_lat["z"]),
        ("KLD", latent_output["KLD"], ref_lat["KLD"]),
        ("y_hat_dms", latent_output["y_hat_dms"], ref_lat["y_hat_dms"]),
    ]
    for name, got, want in checks:
        assert bool(jnp.allclose(got, want, rtol=2e-2, atol=2e-2)), name

    print("KERNEL_OK")
</pallas_src>

<mosaic_0001>
module attributes {stable_mosaic.version = 11 : i64} {
  func.func @_linear_kernel_nok(%arg0: i32, %arg1: i32, %arg2: memref<16x128xbf16, #tpu.memory_space<vmem>>, %arg3: memref<128x128xbf16, #tpu.memory_space<vmem>>, %arg4: memref<1x128xf32, #tpu.memory_space<vmem>>, %arg5: memref<16x128xbf16, #tpu.memory_space<vmem>>) attributes {dimension_semantics = [#tpu.dimension_semantics<parallel>, #tpu.dimension_semantics<parallel>], iteration_bounds = array<i64: 1, 1>, scalar_prefetch = 0 : i64, scratch_operands = 0 : i64, tpu.core_type = #tpu.core_type<tc>, window_params = [{transform_indices = @transform_0, window_bounds = array<i64: 16, 128>}, {transform_indices = @transform_1, window_bounds = array<i64: 128, 128>}, {transform_indices = @transform_2, window_bounds = array<i64: 1, 128>}, {transform_indices = @transform_3, window_bounds = array<i64: 16, 128>}]} {
    %c0 = arith.constant 0 : index
    %c0_0 = arith.constant 0 : index
    %0 = vector.load %arg2[%c0, %c0_0] : memref<16x128xbf16, #tpu.memory_space<vmem>>, vector<16x128xbf16>
    %c0_1 = arith.constant 0 : index
    %c0_2 = arith.constant 0 : index
    %1 = vector.load %arg3[%c0_1, %c0_2] : memref<128x128xbf16, #tpu.memory_space<vmem>>, vector<128x128xbf16>
    %cst = arith.constant dense<0.000000e+00> : vector<16x128xf32>
    %2 = tpu.matmul %0, %1, %cst {dimension_numbers = #tpu.dot_dimension_numbers<[1], [0], [0], [1], [0, 0, 1, 1], [], []>} : vector<16x128xbf16>, vector<128x128xbf16>, vector<16x128xf32> -> vector<16x128xf32>
    %c0_3 = arith.constant 0 : index
    %c0_4 = arith.constant 0 : index
    %3 = vector.load %arg4[%c0_3, %c0_4] : memref<1x128xf32, #tpu.memory_space<vmem>>, vector<1x128xf32>
    %4 = vector.broadcast %3 : vector<1x128xf32> to vector<16x128xf32>
    %5 = arith.addf %2, %4 : vector<16x128xf32>
    %cst_5 = arith.constant 0.000000e+00 : f32
    %6 = vector.broadcast %cst_5 : f32 to vector<16x128xf32>
    %7 = arith.maximumf %5, %6 : vector<16x128xf32>
    %8 = arith.truncf %7 : vector<16x128xf32> to vector<16x128xbf16>
    %c0_6 = arith.constant 0 : index
    %c0_7 = arith.constant 0 : index
    %9 = vector.load %arg5[%c0_6, %c0_7] : memref<16x128xbf16, #tpu.memory_space<vmem>>, vector<16x128xbf16>
    tpu.vector_store %arg5[%c0_6, %c0_7], %8 {strides = array<i32>} : memref<16x128xbf16, #tpu.memory_space<vmem>>, vector<16x128xbf16>,
    return
  }
  func.func @transform_0(%arg0: i32, %arg1: i32) -> (i32, i32) {
    %c0_i32 = arith.constant 0 : i32
    %c0_i32_0 = arith.constant 0 : i32
    return %arg0, %c0_i32 : i32, i32
  }
  func.func @transform_1(%arg0: i32, %arg1: i32) -> (i32, i32) {
    %c0_i32 = arith.constant 0 : i32
    %c0_i32_0 = arith.constant 0 : i32
    return %c0_i32, %arg1 : i32, i32
  }
  func.func @transform_2(%arg0: i32, %arg1: i32) -> (i32, i32) {
    %c0_i32 = arith.constant 0 : i32
    %c0_i32_0 = arith.constant 0 : i32
    return %c0_i32, %arg1 : i32, i32
  }
  func.func @transform_3(%arg0: i32, %arg1: i32) -> (i32, i32) {
    %c0_i32 = arith.constant 0 : i32
    return %arg0, %arg1 : i32, i32
  }
}

module attributes {stable_mosaic.version = 11 : i64} {
  func.func @_latent_kernel(%arg0: i32, %arg1: memref<16x128xbf16, #tpu.memory_space<vmem>>, %arg2: memref<16x128xf32, #tpu.memory_space<vmem>>, %arg3: memref<128x256xbf16, #tpu.memory_space<vmem>>, %arg4: memref<1x256xf32, #tpu.memory_space<vmem>>, %arg5: memref<128x128xbf16, #tpu.memory_space<vmem>>, %arg6: memref<1x128xf32, #tpu.memory_space<vmem>>, %arg7: memref<128x128xbf16, #tpu.memory_space<vmem>>, %arg8: memref<1x128xf32, #tpu.memory_space<vmem>>, %arg9: memref<128x128xbf16, #tpu.memory_space<vmem>>, %arg10: memref<1x128xf32, #tpu.memory_space<vmem>>, %arg11: memref<16x640xf32, #tpu.memory_space<vmem>>, %arg12: memref<16x128xbf16, #tpu.memory_space<vmem>>) attributes {dimension_semantics = [#tpu.dimension_semantics<parallel>], iteration_bounds = array<i64: 1>, scalar_prefetch = 0 : i64, scratch_operands = 0 : i64, tpu.core_type = #tpu.core_type<tc>, window_params = [{transform_indices = @transform_0, window_bounds = array<i64: 16, 128>}, {transform_indices = @transform_1, window_bounds = array<i64: 16, 128>}, {pipeline_mode = #tpu.pipeline_mode<synchronous>, transform_indices = @transform_2, window_bounds = array<i64: 128, 256>}, {pipeline_mode = #tpu.pipeline_mode<synchronous>, transform_indices = @transform_3, window_bounds = array<i64: 1, 256>}, {pipeline_mode = #tpu.pipeline_mode<synchronous>, transform_indices = @transform_4, window_bounds = array<i64: 128, 128>}, {pipeline_mode = #tpu.pipeline_mode<synchronous>, transform_indices = @transform_5, window_bounds = array<i64: 1, 128>}, {pipeline_mode = #tpu.pipeline_mode<synchronous>, transform_indices = @transform_6, window_bounds = array<i64: 128, 128>}, {pipeline_mode = #tpu.pipeline_mode<synchronous>, transform_indices = @transform_7, window_bounds = array<i64: 1, 128>}, {pipeline_mode = #tpu.pipeline_mode<synchronous>, transform_indices = @transform_8, window_bounds = array<i64: 128, 128>}, {pipeline_mode = #tpu.pipeline_mode<synchronous>, transform_indices = @transform_9, window_bounds = array<i64: 1, 128>}, {transform_indices = @transform_10, window_bounds = array<i64: 16, 640>}, {transform_indices = @transform_11, window_bounds = array<i64: 16, 128>}]} {
    %c0 = arith.constant 0 : index
    %c0_0 = arith.constant 0 : index
    %0 = vector.load %arg1[%c0, %c0_0] : memref<16x128xbf16, #tpu.memory_space<vmem>>, vector<16x128xbf16>
    %c0_1 = arith.constant 0 : index
    %c0_2 = arith.constant 0 : index
    %1 = vector.load %arg3[%c0_1, %c0_2] : memref<128x256xbf16, #tpu.memory_space<vmem>>, vector<128x256xbf16>
    %cst = arith.constant dense<0.000000e+00> : vector<16x256xf32>
    %2 = tpu.matmul %0, %1, %cst {dimension_numbers = #tpu.dot_dimension_numbers<[1], [0], [0], [1], [0, 0, 1, 1], [], []>} : vector<16x128xbf16>, vector<128x256xbf16>, vector<16x256xf32> -> vector<16x256xf32>
    %c0_3 = arith.constant 0 : index
    %c0_4 = arith.constant 0 : index
    %3 = vector.load %arg4[%c0_3, %c0_4] : memref<1x256xf32, #tpu.memory_space<vmem>>, vector<1x256xf32>
    %4 = vector.broadcast %3 : vector<1x256xf32> to vector<16x256xf32>
    %5 = arith.addf %2, %4 : vector<16x256xf32>
    %6 = vector.extract_strided_slice %5 {offsets = [0, 0], sizes = [16, 128], strides = [1, 1]} : vector<16x256xf32> to vector<16x128xf32>
    %7 = vector.extract_strided_slice %5 {offsets = [0, 128], sizes = [16, 128], strides = [1, 1]} : vector<16x256xf32> to vector<16x128xf32>
    %cst_5 = arith.constant 5.000000e-01 : f32
    %8 = vector.broadcast %cst_5 : f32 to vector<16x128xf32>
    %9 = arith.mulf %8, %7 : vector<16x128xf32>
    %10 = math.exp %9 : vector<16x128xf32>
    %c0_6 = arith.constant 0 : index
    %c0_7 = arith.constant 0 : index
    %11 = vector.load %arg2[%c0_6, %c0_7] : memref<16x128xf32, #tpu.memory_space<vmem>>, vector<16x128xf32>
    %12 = arith.mulf %10, %11 : vector<16x128xf32>
    %13 = arith.addf %6, %12 : vector<16x128xf32>
    %cst_8 = arith.constant 1.000000e+00 : f32
    %14 = vector.broadcast %cst_8 : f32 to vector<16x128xf32>
    %15 = arith.addf %14, %7 : vector<16x128xf32>
    %16 = arith.mulf %6, %6 : vector<16x128xf32>
    %17 = arith.subf %15, %16 : vector<16x128xf32>
    %18 = arith.mulf %10, %10 : vector<16x128xf32>
    %19 = arith.subf %17, %18 : vector<16x128xf32>
    %cst_9 = arith.constant dense<0.000000e+00> : vector<16xf32>
    %20 = vector.multi_reduction <add>, %19, %cst_9 [1] : vector<16x128xf32> to vector<16xf32>
    %21 = vector.shape_cast %20 : vector<16xf32> to vector<16x1xf32>
    %cst_10 = arith.constant -5.000000e-01 : f32
    %22 = vector.broadcast %cst_10 : f32 to vector<16x1xf32>
    %23 = arith.mulf %22, %21 : vector<16x1xf32>
    %24 = arith.truncf %6 : vector<16x128xf32> to vector<16x128xbf16>
    %c0_11 = arith.constant 0 : index
    %c0_12 = arith.constant 0 : index
    %25 = vector.load %arg5[%c0_11, %c0_12] : memref<128x128xbf16, #tpu.memory_space<vmem>>, vector<128x128xbf16>
    %cst_13 = arith.constant dense<0.000000e+00> : vector<16x128xf32>
    %26 = tpu.matmul %24, %25, %cst_13 {dimension_numbers = #tpu.dot_dimension_numbers<[1], [0], [0], [1], [0, 0, 1, 1], [], []>} : vector<16x128xbf16>, vector<128x128xbf16>, vector<16x128xf32> -> vector<16x128xf32>
    %c0_14 = arith.constant 0 : index
    %c0_15 = arith.constant 0 : index
    %27 = vector.load %arg6[%c0_14, %c0_15] : memref<1x128xf32, #tpu.memory_space<vmem>>, vector<1x128xf32>
    %28 = vector.broadcast %27 : vector<1x128xf32> to vector<16x128xf32>
    %29 = arith.addf %26, %28 : vector<16x128xf32>
    %cst_16 = arith.constant 0.000000e+00 : f32
    %30 = vector.broadcast %cst_16 : f32 to vector<16x128xf32>
    %31 = arith.maximumf %29, %30 : vector<16x128xf32>
    %32 = arith.truncf %31 : vector<16x128xf32> to vector<16x128xbf16>
    %c0_17 = arith.constant 0 : index
    %c0_18 = arith.constant 0 : index
    %33 = vector.load %arg7[%c0_17, %c0_18] : memref<128x128xbf16, #tpu.memory_space<vmem>>, vector<128x128xbf16>
    %cst_19 = arith.constant dense<0.000000e+00> : vector<16x128xf32>
    %34 = tpu.matmul %32, %33, %cst_19 {dimension_numbers = #tpu.dot_dimension_numbers<[1], [0], [0], [1], [0, 0, 1, 1], [], []>} : vector<16x128xbf16>, vector<128x128xbf16>, vector<16x128xf32> -> vector<16x128xf32>
    %c0_20 = arith.constant 0 : index
    %c0_21 = arith.constant 0 : index
    %35 = vector.load %arg8[%c0_20, %c0_21] : memref<1x128xf32, #tpu.memory_space<vmem>>, vector<1x128xf32>
    %36 = vector.broadcast %35 : vector<1x128xf32> to vector<16x128xf32>
    %37 = arith.addf %34, %36 : vector<16x128xf32>
    %38 = arith.negf %37 : vector<16x128xf32>
    %39 = math.exp %38 : vector<16x128xf32>
    %cst_22 = arith.constant 1.000000e+00 : f32
    %40 = vector.broadcast %cst_22 : f32 to vector<16x128xf32>
    %41 = arith.addf %40, %39 : vector<16x128xf32>
    %42 = arith.divf %40, %41 : vector<16x128xf32>
    %43 = arith.truncf %13 : vector<16x128xf32> to vector<16x128xbf16>
    %c0_23 = arith.constant 0 : index
    %c0_24 = arith.constant 0 : index
    %44 = vector.load %arg9[%c0_23, %c0_24] : memref<128x128xbf16, #tpu.memory_space<vmem>>, vector<128x128xbf16>
    %cst_25 = arith.constant dense<0.000000e+00> : vector<16x128xf32>
    %45 = tpu.matmul %43, %44, %cst_25 {dimension_numbers = #tpu.dot_dimension_numbers<[1], [0], [0], [1], [0, 0, 1, 1], [], []>} : vector<16x128xbf16>, vector<128x128xbf16>, vector<16x128xf32> -> vector<16x128xf32>
    %c0_26 = arith.constant 0 : index
    %c0_27 = arith.constant 0 : index
    %46 = vector.load %arg10[%c0_26, %c0_27] : memref<1x128xf32, #tpu.memory_space<vmem>>, vector<1x128xf32>
    %47 = vector.broadcast %46 : vector<1x128xf32> to vector<16x128xf32>
    %48 = arith.addf %45, %47 : vector<16x128xf32>
    %cst_28 = arith.constant 0.000000e+00 : f32
    %49 = vector.broadcast %cst_28 : f32 to vector<16x128xf32>
    %50 = arith.maximumf %48, %49 : vector<16x128xf32>
    %c0_29 = arith.constant 0 : index
    %c0_30 = arith.constant 0 : index
    %51 = vector.load %arg11[%c0_29, %c0_30] : memref<16x640xf32, #tpu.memory_space<vmem>>, vector<16x256xf32>
    tpu.vector_store %arg11[%c0_29, %c0_30], %5 {strides = array<i32>} : memref<16x640xf32, #tpu.memory_space<vmem>>, vector<16x256xf32>,
    %c0_31 = arith.constant 0 : index
    %c256 = arith.constant 256 : index
    %52 = vector.load %arg11[%c0_31, %c256] : memref<16x640xf32, #tpu.memory_space<vmem>>, vector<16x128xf32>
    tpu.vector_store %arg11[%c0_31, %c256], %13 {strides = array<i32>} : memref<16x640xf32, #tpu.memory_space<vmem>>, vector<16x128xf32>,
    %53 = vector.shape_cast %23 : vector<16x1xf32> to vector<16x1xf32>
    %54 = vector.broadcast %53 : vector<16x1xf32> to vector<16x128xf32>
    %c0_32 = arith.constant 0 : index
    %c384 = arith.constant 384 : index
    %55 = vector.load %arg11[%c0_32, %c384] : memref<16x640xf32, #tpu.memory_space<vmem>>, vector<16x128xf32>
    tpu.vector_store %arg11[%c0_32, %c384], %54 {strides = array<i32>} : memref<16x640xf32, #tpu.memory_space<vmem>>, vector<16x128xf32>,
    %c0_33 = arith.constant 0 : index
    %c512 = arith.constant 512 : index
    %56 = vector.load %arg11[%c0_33, %c512] : memref<16x640xf32, #tpu.memory_space<vmem>>, vector<16x128xf32>
    tpu.vector_store %arg11[%c0_33, %c512], %42 {strides = array<i32>} : memref<16x640xf32, #tpu.memory_space<vmem>>, vector<16x128xf32>,
    %57 = arith.truncf %50 : vector<16x128xf32> to vector<16x128xbf16>
    %c0_34 = arith.constant 0 : index
    %c0_35 = arith.constant 0 : index
    %58 = vector.load %arg12[%c0_34, %c0_35] : memref<16x128xbf16, #tpu.memory_space<vmem>>, vector<16x128xbf16>
    tpu.vector_store %arg12[%c0_34, %c0_35], %57 {strides = array<i32>} : memref<16x128xbf16, #tpu.memory_space<vmem>>, vector<16x128xbf16>,
    return
  }
  func.func @transform_0(%arg0: i32) -> (i32, i32) {
    %c0_i32 = arith.constant 0 : i32
    %c0_i32_0 = arith.constant 0 : i32
    return %arg0, %c0_i32 : i32, i32
  }
  func.func @transform_1(%arg0: i32) -> (i32, i32) {
    %c0_i32 = arith.constant 0 : i32
    %c0_i32_0 = arith.constant 0 : i32
    return %arg0, %c0_i32 : i32, i32
  }
  func.func @transform_2(%arg0: i32) -> (i32, i32) {
    %c0_i32 = arith.constant 0 : i32
    %c0_i32_0 = arith.constant 0 : i32
    %c0_i32_1 = arith.constant 0 : i32
    return %c0_i32, %c0_i32_0 : i32, i32
  }
  func.func @transform_3(%arg0: i32) -> (i32, i32) {
    %c0_i32 = arith.constant 0 : i32
    %c0_i32_0 = arith.constant 0 : i32
    %c0_i32_1 = arith.constant 0 : i32
    return %c0_i32, %c0_i32_0 : i32, i32
  }
  func.func @transform_4(%arg0: i32) -> (i32, i32) {
    %c0_i32 = arith.constant 0 : i32
    %c0_i32_0 = arith.constant 0 : i32
    %c0_i32_1 = arith.constant 0 : i32
    return %c0_i32, %c0_i32_0 : i32, i32
  }
  func.func @transform_5(%arg0: i32) -> (i32, i32) {
    %c0_i32 = arith.constant 0 : i32
    %c0_i32_0 = arith.constant 0 : i32
    %c0_i32_1 = arith.constant 0 : i32
    return %c0_i32, %c0_i32_0 : i32, i32
  }
  func.func @transform_6(%arg0: i32) -> (i32, i32) {
    %c0_i32 = arith.constant 0 : i32
    %c0_i32_0 = arith.constant 0 : i32
    %c0_i32_1 = arith.constant 0 : i32
    return %c0_i32, %c0_i32_0 : i32, i32
  }
  func.func @transform_7(%arg0: i32) -> (i32, i32) {
    %c0_i32 = arith.constant 0 : i32
    %c0_i32_0 = arith.constant 0 : i32
    %c0_i32_1 = arith.constant 0 : i32
    return %c0_i32, %c0_i32_0 : i32, i32
  }
  func.func @transform_8(%arg0: i32) -> (i32, i32) {
    %c0_i32 = arith.constant 0 : i32
    %c0_i32_0 = arith.constant 0 : i32
    %c0_i32_1 = arith.constant 0 : i32
    return %c0_i32, %c0_i32_0 : i32, i32
  }
  func.func @transform_9(%arg0: i32) -> (i32, i32) {
    %c0_i32 = arith.constant 0 : i32
    %c0_i32_0 = arith.constant 0 : i32
    %c0_i32_1 = arith.constant 0 : i32
    return %c0_i32, %c0_i32_0 : i32, i32
  }
  func.func @transform_10(%arg0: i32) -> (i32, i32) {
    %c0_i32 = arith.constant 0 : i32
    %c0_i32_0 = arith.constant 0 : i32
    return %arg0, %c0_i32 : i32, i32
  }
  func.func @transform_11(%arg0: i32) -> (i32, i32) {
    %c0_i32 = arith.constant 0 : i32
    %c0_i32_0 = arith.constant 0 : i32
    return %arg0, %c0_i32 : i32, i32
  }
}

module attributes {stable_mosaic.version = 11 : i64} {
  func.func @_linear_kernel_nok(%arg0: i32, %arg1: i32, %arg2: memref<16x128xbf16, #tpu.memory_space<vmem>>, %arg3: memref<128x128xbf16, #tpu.memory_space<vmem>>, %arg4: memref<1x128xf32, #tpu.memory_space<vmem>>, %arg5: memref<16x128xf32, #tpu.memory_space<vmem>>) attributes {dimension_semantics = [#tpu.dimension_semantics<parallel>, #tpu.dimension_semantics<parallel>], iteration_bounds = array<i64: 1, 1>, scalar_prefetch = 0 : i64, scratch_operands = 0 : i64, tpu.core_type = #tpu.core_type<tc>, window_params = [{transform_indices = @transform_0, window_bounds = array<i64: 16, 128>}, {transform_indices = @transform_1, window_bounds = array<i64: 128, 128>}, {transform_indices = @transform_2, window_bounds = array<i64: 1, 128>}, {transform_indices = @transform_3, window_bounds = array<i64: 16, 128>}]} {
    %c0 = arith.constant 0 : index
    %c0_0 = arith.constant 0 : index
    %0 = vector.load %arg2[%c0, %c0_0] : memref<16x128xbf16, #tpu.memory_space<vmem>>, vector<16x128xbf16>
    %c0_1 = arith.constant 0 : index
    %c0_2 = arith.constant 0 : index
    %1 = vector.load %arg3[%c0_1, %c0_2] : memref<128x128xbf16, #tpu.memory_space<vmem>>, vector<128x128xbf16>
    %cst = arith.constant dense<0.000000e+00> : vector<16x128xf32>
    %2 = tpu.matmul %0, %1, %cst {dimension_numbers = #tpu.dot_dimension_numbers<[1], [0], [0], [1], [0, 0, 1, 1], [], []>} : vector<16x128xbf16>, vector<128x128xbf16>, vector<16x128xf32> -> vector<16x128xf32>
    %c0_3 = arith.constant 0 : index
    %c0_4 = arith.constant 0 : index
    %3 = vector.load %arg4[%c0_3, %c0_4] : memref<1x128xf32, #tpu.memory_space<vmem>>, vector<1x128xf32>
    %4 = vector.broadcast %3 : vector<1x128xf32> to vector<16x128xf32>
    %5 = arith.addf %2, %4 : vector<16x128xf32>
    %c0_5 = arith.constant 0 : index
    %c0_6 = arith.constant 0 : index
    %6 = vector.load %arg5[%c0_5, %c0_6] : memref<16x128xf32, #tpu.memory_space<vmem>>, vector<16x128xf32>
    tpu.vector_store %arg5[%c0_5, %c0_6], %5 {strides = array<i32>} : memref<16x128xf32, #tpu.memory_space<vmem>>, vector<16x128xf32>,
    return
  }
  func.func @transform_0(%arg0: i32, %arg1: i32) -> (i32, i32) {
    %c0_i32 = arith.constant 0 : i32
    %c0_i32_0 = arith.constant 0 : i32
    return %arg0, %c0_i32 : i32, i32
  }
  func.func @transform_1(%arg0: i32, %arg1: i32) -> (i32, i32) {
    %c0_i32 = arith.constant 0 : i32
    %c0_i32_0 = arith.constant 0 : i32
    return %c0_i32, %arg1 : i32, i32
  }
  func.func @transform_2(%arg0: i32, %arg1: i32) -> (i32, i32) {
    %c0_i32 = arith.constant 0 : i32
    %c0_i32_0 = arith.constant 0 : i32
    return %c0_i32, %arg1 : i32, i32
  }
  func.func @transform_3(%arg0: i32, %arg1: i32) -> (i32, i32) {
    %c0_i32 = arith.constant 0 : i32
    return %arg0, %arg1 : i32, i32
  }
}

</mosaic_0001>

<bundles_post_ra>
// kernel: forward.3
= control target key start
LH: loop header
LB: loop body
LE: loop exit
PB: predicated region body
PF: predicated region fallthrough
CT: control target
= control target key end

     0   :  { %8 = vsyncpa [#allocation3], 0  ;;  %s252_s12 = smov [#allocation2]   ;;  %s298_s0 = inlined_call_operand.vmem [shape: bf16[16,128], index: 0, kind: input, shape index: {}]   ;;  %s299_s1 = inlined_call_operand.hbm [shape: bf16[128,128], index: 1, kind: input, shape index: {}]   ;;  %s300_s2 = inlined_call_operand.vmem [shape: f32[1,128], index: 2, kind: input, shape index: {}]   ;;  %s301_s3 = inlined_call_operand.vmem [shape: bf16[16,128], index: 3, kind: output, shape index: {}]  }
   0x1   :  { %s16_s13 = sshll.u32 %s252_s12, 4  ;;  %s228_s16 = scalar_lea.hbm %s299_s1, 1024  ;;  %s17_s13 = int_to_ptr.vmem [resolvable:$true] %s16_s13 }
   0x2   :  { %p229_p0 = scmp.ne.s32.totalorder %s299_s1, %s228_s16  ;;  %p232_p1 = scmp.lt.u32.totalorder %s228_s16, %s299_s1 }
   0x4   :  { %p234_p2 = pnand %p232_p1, %p229_p0 }
   0x6   :  { %237 = shalt.err (!%p234_p2)
}
   0x7   :  { %s238_s21 = scalar_lea.vmem %s17_s13, 1024  ;;  %p243_p4 = scmp.lt.s32.totalorder %s17_s13, %s17_s13 }
   0x8   :  { %p239_p3 = scmp.ne.s32.totalorder %s17_s13, %s238_s21  ;;  %p244_p5 = scmp.lt.s32.totalorder %s238_s21, %s238_s21 }
   0xa   :  { %p245_p6 = por %p244_p5, %p243_p4 }
   0xc   :  { %p246_p7 = pnand %p245_p6, %p239_p3 }
   0xe   :  { %249 = shalt.err (!%p246_p7)
}
   0xf   :  { %s253_s22 = smov 64   ;;  %s254_s23 = smov 4  }
  0x10   :  { %22 = dma.hbm_to_vmem [thread:$0]  %s299_s1, 1024, %s17_s13, [#allocation3], %s253_s22, %s253_s22, %s254_s23  }
  0x11   :  { %250 = dma.done.wait [#allocation3], 1024  }
  0x12   :  { %251 = vsyncadd [#allocation3], 4294966272  ;;  %v255_v0 = vmov 0.0   ;;  %vm256_vm0 = vmmov 0   ;;  %v219_v1 = vld [vmem:[#allocation2] sm:$0xff]   ;;  %v220_v2 = vld [vmem:[#allocation2 + $0x8] sm:$0xff]  }
  0x13   :  { %194 = vmatprep.subr.bf16.mxu0 %v255_v0  ;;  %210 = vmatprep.mubr.msk.bf16.mxu0 %vm256_vm0, %v255_v0  ;;  %v221_v3 = vld [vmem:[#allocation2 + $0x10] sm:$0xff]   ;;  %v222_v4 = vld [vmem:[#allocation2 + $0x18] sm:$0xff]   ;;  %v223_v5 = vld [vmem:[#allocation2 + $0x20] sm:$0xff]  }
  0x14   :  { %195 = vmatpush3.bf16.msra.mxu0 %v219_v1  ;;  %v224_v6 = vld [vmem:[#allocation2 + $0x28] sm:$0xff]   ;;  %v225_v7 = vld [vmem:[#allocation2 + $0x30] sm:$0xff]   ;;  %v226_v8 = vld [vmem:[#allocation2 + $0x38] sm:$0xff]  }
  0x15   :  { %196 = vmatprep.subr.bf16.mxu0 %v255_v0  ;;  %v227_v9 = vld [vmem:[%s298_s0] sm:$0xff]  }
  0x16   :  { %v166_v10 = vld [vmem:[%s300_s2] ss:$0 sm:$0xff] }
  0x18   :  { %197 = vmatpush3.bf16.msra.mxu0 %v220_v2 }
  0x19   :  { %198 = vmatprep.subr.bf16.mxu0 %v255_v0 }
  0x1c   :  { %199 = vmatpush3.bf16.msra.mxu0 %v221_v3 }
  0x1d   :  { %200 = vmatprep.subr.bf16.mxu0 %v255_v0 }
  0x20   :  { %201 = vmatpush3.bf16.msra.mxu0 %v222_v4 }
  0x21   :  { %202 = vmatprep.subr.bf16.mxu0 %v255_v0 }
  0x24   :  { %203 = vmatpush3.bf16.msra.mxu0 %v223_v5 }
  0x25   :  { %204 = vmatprep.subr.bf16.mxu0 %v255_v0 }
  0x28   :  { %205 = vmatpush3.bf16.msra.mxu0 %v224_v6 }
  0x29   :  { %206 = vmatprep.subr.bf16.mxu0 %v255_v0 }
  0x2c   :  { %207 = vmatpush3.bf16.msra.mxu0 %v225_v7 }
  0x2d   :  { %208 = vmatprep.subr.bf16.mxu0 %v255_v0 }
  0x30   :  { %209 = vmatpush3.bf16.msra.mxu0 %v226_v8 }
  0x33   :  { %211 = vmatmul.mubr.bf16.vlgmr.msra.gmra.mrb[0].mxu0 %v227_v9 }
 0x106   :  { %v142_v11 = vpop.f32.mrb[0].mxu0 }
 0x107   :  { %v143_v12 = vadd.f32 %v166_v10, %v142_v11  ;;  %v212_v13 = vpop.f32.mrb[1].mxu0 }
 0x108   :  { %v145_v14 = vpop.f32.mrb[2].mxu0 }
 0x109   :  { %v146_v15 = vadd.f32 %v166_v10, %v145_v14  ;;  %v213_v16 = vpop.f32.mrb[3].mxu0  ;;  %v149_v17 = vmax.f32 %v143_v12, 0.0 }
 0x10b   :  { %v150_v18 = vmax.f32 %v146_v15, 0.0 }
 0x10d   :  { %v183_v19 = vpack.c.bf16 %v150_v18, %v149_v17 }
 0x10f   :  { %184 = vst [vmem:[%s301_s3] sm:$0xff] %v183_v19  }
 0x110   :  { %165 = vsyncpa [#allocation3], 1 }

// kernel: forward.5
= control target key start
LH: loop header
LB: loop body
LE: loop exit
PB: predicated region body
PF: predicated region fallthrough
CT: control target
= control target key end

     0   :  { %v191_v0 = vmov 0.0   ;;  %vm192_vm0 = vmmov 0   ;;  %s249_s1 = inlined_call_operand.vmem [shape: bf16[128,128], index: 1, kind: input, shape index: {}]   ;;  %s250_s0 = inlined_call_operand.vmem [shape: bf16[16,128], index: 0, kind: input, shape index: {}]   ;;  %s251_s2 = inlined_call_operand.vmem [shape: f32[1,128], index: 2, kind: input, shape index: {}]   ;;  %s252_s3 = inlined_call_operand.vmem [shape: f32[16,128], index: 3, kind: output, shape index: {}]  }
   0x1   :  { %160 = vmatprep.subr.bf16.mxu0 %v191_v0  ;;  %v182_v1 = vld [vmem:[%s249_s1] sm:$0xff]   ;;  %176 = vmatprep.mubr.msk.bf16.mxu0 %vm192_vm0, %v191_v0  ;;  %v183_v2 = vld [vmem:[%s249_s1 + $0x8] sm:$0xff]   ;;  %v184_v3 = vld [vmem:[%s249_s1 + $0x10] sm:$0xff]  }
   0x2   :  { %161 = vmatpush3.bf16.msra.mxu0 %v182_v1  ;;  %v185_v4 = vld [vmem:[%s249_s1 + $0x18] sm:$0xff]   ;;  %v186_v5 = vld [vmem:[%s249_s1 + $0x20] sm:$0xff]   ;;  %v187_v6 = vld [vmem:[%s249_s1 + $0x28] sm:$0xff]  }
   0x3   :  { %162 = vmatprep.subr.bf16.mxu0 %v191_v0  ;;  %v188_v7 = vld [vmem:[%s249_s1 + $0x30] sm:$0xff]   ;;  %v189_v8 = vld [vmem:[%s249_s1 + $0x38] sm:$0xff]   ;;  %v190_v9 = vld [vmem:[%s250_s0] sm:$0xff]  }
   0x4   :  { %v141_v10 = vld [vmem:[%s251_s2] ss:$0 sm:$0xff] }
   0x6   :  { %163 = vmatpush3.bf16.msra.mxu0 %v183_v2 }
   0x7   :  { %164 = vmatprep.subr.bf16.mxu0 %v191_v0 }
   0xa   :  { %165 = vmatpush3.bf16.msra.mxu0 %v184_v3 }
   0xb   :  { %166 = vmatprep.subr.bf16.mxu0 %v191_v0 }
   0xe   :  { %167 = vmatpush3.bf16.msra.mxu0 %v185_v4 }
   0xf   :  { %168 = vmatprep.subr.bf16.mxu0 %v191_v0 }
  0x12   :  { %169 = vmatpush3.bf16.msra.mxu0 %v186_v5 }
  0x13   :  { %170 = vmatprep.subr.bf16.mxu0 %v191_v0 }
  0x16   :  { %171 = vmatpush3.bf16.msra.mxu0 %v187_v6 }
  0x17   :  { %172 = vmatprep.subr.bf16.mxu0 %v191_v0 }
  0x1a   :  { %173 = vmatpush3.bf16.msra.mxu0 %v188_v7 }
  0x1b   :  { %174 = vmatprep.subr.bf16.mxu0 %v191_v0 }
  0x1e   :  { %175 = vmatpush3.bf16.msra.mxu0 %v189_v8 }
  0x21   :  { %177 = vmatmul.mubr.bf16.vlgmr.msra.gmra.mrb[0].mxu0 %v190_v9 }
  0xf4   :  { %v128_v11 = vpop.f32.mrb[0].mxu0 }
  0xf5   :  { %v129_v12 = vadd.f32 %v141_v10, %v128_v11  ;;  %v178_v13 = vpop.f32.mrb[1].mxu0 }
  0xf6   :  { %v131_v14 = vpop.f32.mrb[2].mxu0 }
  0xf7   :  { %135 = vst [vmem:[%s252_s3] sm:$0xff] %v129_v12  ;;  %v132_v15 = vadd.f32 %v141_v10, %v131_v14  ;;  %v179_v16 = vpop.f32.mrb[3].mxu0 }
  0xf9   :  { %136 = vst [vmem:[%s252_s3 + $0x8] sm:$0xff] %v132_v15 }

// kernel: forward.4
= control target key start
LH: loop header
LB: loop body
LE: loop exit
PB: predicated region body
PF: predicated region fallthrough
CT: control target
= control target key end

     0   :  { %17 = vsyncpa [#allocation3], 0  ;;  %s1184_s0 = inlined_call_operand.vmem [shape: bf16[16,128], index: 0, kind: input, shape index: {}]   ;;  %s1185_s1 = inlined_call_operand.vmem [shape: f32[16,128], index: 1, kind: input, shape index: {}]   ;;  %s1186_s2 = inlined_call_operand.vmem [shape: bf16[128,256], index: 2, kind: input, shape index: {}]   ;;  %s1187_s3 = inlined_call_operand.vmem [shape: f32[1,256], index: 3, kind: input, shape index: {}]   ;;  %s1188_s4 = inlined_call_operand.hbm [shape: bf16[128,128], index: 4, kind: input, shape index: {}]   ;;  %s1189_s5 = inlined_call_operand.vmem [shape: f32[1,128], index: 5, kind: input, shape index: {}]   ;;  %s1190_s6 = inlined_call_operand.hbm [shape: bf16[128,128], index: 6, kind: input, shape index: {}]   ;;  %s1191_s7 = inlined_call_operand.vmem [shape: f32[1,128], index: 7, kind: input, shape index: {}]   ;;  %s1192_s8 = inlined_call_operand.hbm [shape: bf16[128,128], index: 8, kind: input, shape index: {}]   ;;  %s1193_s9 = inlined_call_operand.vmem [shape: f32[1,128], index: 9, kind: input, shape index: {}]   ;;  %s1194_s10 = inlined_call_operand.vmem [shape: f32[16,640], index: 10, kind: output, shape index: {0}]   ;;  %s1195_s11 = inlined_call_operand.vmem [shape: bf16[16,128], index: 11, kind: output, shape index: {1}]  }
   0x1   :  { %18 = vsyncpa [#allocation5], 0  ;;  %s932_s17 = smov [#allocation4]   ;;  %s933_s19 = smov [#allocation2]  }
   0x2   :  { %s46_s18 = sshll.u32 %s932_s17, 4  ;;  %s32_s20 = sshll.u32 %s933_s19, 4  ;;  %s47_s18 = int_to_ptr.vmem [resolvable:$true] %s46_s18  ;;  %s1000_s20 = int_to_ptr.vmem [resolvable:$true] %s32_s20 }
   0x3   :  { %s862_s23 = scalar_lea.hbm %s1190_s6, 1024 }
   0x4   :  { %p863_p0 = scmp.ne.s32.totalorder %s1190_s6, %s862_s23  ;;  %p866_p1 = scmp.lt.u32.totalorder %s862_s23, %s1190_s6 }
   0x6   :  { %p868_p2 = pnand %p866_p1, %p863_p0 }
   0x8   :  { %871 = shalt.err (!%p868_p2)
}
   0x9   :  { %s872_s28 = scalar_lea.vmem %s47_s18, 1024  ;;  %p877_p4 = scmp.lt.s32.totalorder %s47_s18, %s47_s18 }
   0xa   :  { %p873_p3 = scmp.ne.s32.totalorder %s47_s18, %s872_s28  ;;  %p878_p5 = scmp.lt.s32.totalorder %s872_s28, %s872_s28 }
   0xc   :  { %p879_p6 = por %p878_p5, %p877_p4 }
   0xe   :  { %p880_p7 = pnand %p879_p6, %p873_p3 }
  0x10   :  { %883 = shalt.err (!%p880_p7)
}
  0x11   :  { %s934_s29 = smov 64   ;;  %s935_s30 = smov 4  }
  0x12   :  { %52 = dma.hbm_to_vmem [thread:$0]  %s1190_s6, 1024, %s47_s18, [#allocation5], %s934_s29, %s934_s29, %s935_s30  }
  0x13   :  { %s884_s16 = scalar_lea.hbm %s1188_s4, 1024 }
  0x14   :  { %p885_p8 = scmp.ne.s32.totalorder %s1188_s4, %s884_s16  ;;  %p888_p9 = scmp.lt.u32.totalorder %s884_s16, %s1188_s4 }
  0x16   :  { %p890_p10 = pnand %p888_p9, %p885_p8 }
  0x18   :  { %893 = shalt.err (!%p890_p10)
}
  0x19   :  { %s894_s23 = scalar_lea.vmem %s1000_s20, 1024  ;;  %p899_p12 = scmp.lt.s32.totalorder %s1000_s20, %s1000_s20 }
  0x1a   :  { %p895_p11 = scmp.ne.s32.totalorder %s1000_s20, %s894_s23  ;;  %p900_p13 = scmp.lt.s32.totalorder %s894_s23, %s894_s23 }
  0x1c   :  { %p901_p0 = por %p900_p13, %p899_p12 }
  0x1e   :  { %p902_p1 = pnand %p901_p0, %p895_p11 }
  0x20   :  { %905 = shalt.err (!%p902_p1)
}
  0x21   :  { %38 = dma.hbm_to_vmem [thread:$0]  %s1188_s4, 1024, %s1000_s20, [#allocation3], %s934_s29, %s934_s29, %s935_s30  }
  0x22   :  { %s936_s24 = smov [#allocation6]   ;;  %s906_s28 = scalar_lea.hbm %s1192_s8, 1024 }
  0x23   :  { %s60_s25 = sshll.u32 %s936_s24, 4  ;;  %p907_p2 = scmp.ne.s32.totalorder %s1192_s8, %s906_s28  ;;  %s61_s25 = int_to_ptr.vmem [resolvable:$true] %s60_s25 }
  0x24   :  { %p910_p3 = scmp.lt.u32.totalorder %s906_s28, %s1192_s8 }
  0x26   :  { %p912_p4 = pnand %p910_p3, %p907_p2 }
  0x28   :  { %915 = shalt.err (!%p912_p4)
}
  0x29   :  { %s916_s16 = scalar_lea.vmem %s61_s25, 1024  ;;  %p921_p6 = scmp.lt.s32.totalorder %s61_s25, %s61_s25 }
  0x2a   :  { %p917_p5 = scmp.ne.s32.totalorder %s61_s25, %s916_s16  ;;  %p922_p7 = scmp.lt.s32.totalorder %s916_s16, %s916_s16 }
  0x2c   :  { %p923_p8 = por %p922_p7, %p921_p6 }
  0x2e   :  { %p924_p9 = pnand %p923_p8, %p917_p5 }
  0x30   :  { %927 = shalt.err (!%p924_p9)
}
  0x31   :  { %66 = dma.hbm_to_vmem [thread:$0]  %s1192_s8, 1024, %s61_s25, [#allocation5], %s934_s29, %s934_s29, %s935_s30  }
  0x32   :  { %928 = dma.done.wait [#allocation3], 1024  }
  0x33   :  { %929 = vsyncadd [#allocation3], 4294966272 }
  0x34   :  { %930 = dma.done.wait [#allocation5], 2048  }
  0x35   :  { %931 = vsyncadd [#allocation5], 4294965248  ;;  %v937_v0 = vmov 0   ;;  %v938_v1 = vmov 0.0   ;;  %v801_v2 = vld [vmem:[%s1186_s2 + $0x4] ss:$8 sps:$4 sm:$0xff]   ;;  %v99_v27 = vlaneseq }
  0x36   :  { %227 = vmatprep.mubr.bf16.mxu0 %v937_v0  ;;  %733 = vmatprep.subr.bf16.mxu1 %v938_v1  ;;  %v803_v3 = vld [vmem:[%s1186_s2] ss:$8 sps:$4 sm:$0xff]   ;;  %v804_v4 = vld [vmem:[%s1186_s2 + $0x14] ss:$8 sps:$4 sm:$0xff]   ;;  %v806_v5 = vld [vmem:[%s1186_s2 + $0x10] ss:$8 sps:$4 sm:$0xff]  }
  0x37   :  { %195 = vmatprep.subr.bf16.mxu0 %v801_v2  ;;  %v807_v6 = vld [vmem:[%s1186_s2 + $0x24] ss:$8 sps:$4 sm:$0xff]   ;;  %v809_v7 = vld [vmem:[%s1186_s2 + $0x20] ss:$8 sps:$4 sm:$0xff]   ;;  %v810_v8 = vld [vmem:[%s1186_s2 + $0x34] ss:$8 sps:$4 sm:$0xff]  }
  0x38   :  { %196 = vmatpush1.bf16.msra.mxu0 %v803_v3  ;;  %v812_v9 = vld [vmem:[%s1186_s2 + $0x30] ss:$8 sps:$4 sm:$0xff]   ;;  %v813_v10 = vld [vmem:[%s1186_s2 + $0x44] ss:$8 sps:$4 sm:$0xff]   ;;  %v815_v13 = vld [vmem:[%s1186_s2 + $0x40] ss:$8 sps:$4 sm:$0xff]  }
  0x39   :  { %197 = vmatprep.subr.bf16.mxu0 %v804_v4  ;;  %v826_v11 = vld [vmem:[#allocation2] sm:$0xff]   ;;  %v827_v12 = vld [vmem:[#allocation2 + $0x8] sm:$0xff]   ;;  %v816_v14 = vld [vmem:[%s1186_s2 + $0x54] ss:$8 sps:$4 sm:$0xff]   ;;  %vm939_vm0 = vmmov 0   ;;  %v100_v28 = vshrl.u32 %v99_v27, 7 }
  0x3a   :  { %734 = vmatpush3.bf16.msra.mxu1 %v826_v11  ;;  %v818_v15 = vld [vmem:[%s1186_s2 + $0x50] ss:$8 sps:$4 sm:$0xff]   ;;  %v819_v16 = vld [vmem:[%s1186_s2 + $0x64] ss:$8 sps:$4 sm:$0xff]   ;;  %v821_v19 = vld [vmem:[%s1186_s2 + $0x60] ss:$8 sps:$4 sm:$0xff]   ;;  %749 = vmatprep.mubr.msk.bf16.mxu1 %vm939_vm0, %v938_v1 }
  0x3b   :  { %735 = vmatprep.subr.bf16.mxu1 %v938_v1  ;;  %v828_v17 = vld [vmem:[#allocation2 + $0x10] sm:$0xff]   ;;  %v829_v18 = vld [vmem:[#allocation2 + $0x18] sm:$0xff]   ;;  %v830_v21 = vld [vmem:[#allocation2 + $0x20] sm:$0xff]   ;;  %v101_v29 = vsub.s32 0, %v100_v28  ;;  %v105_v31 = vsub.s32 1, %v100_v28 }
  0x3c   :  { %198 = vmatpush1.bf16.msra.mxu0 %v806_v5  ;;  %v822_v20 = vld [vmem:[%s1186_s2 + $0x74] ss:$8 sps:$4 sm:$0xff]   ;;  %v824_v22 = vld [vmem:[%s1186_s2 + $0x70] ss:$8 sps:$4 sm:$0xff]   ;;  %v825_v23 = vld [vmem:[%s1184_s0] sm:$0xff]  }
  0x3d   :  { %199 = vmatprep.subr.bf16.mxu0 %v807_v6  ;;  %v831_v24 = vld [vmem:[#allocation2 + $0x28] sm:$0xff]   ;;  %v832_v25 = vld [vmem:[#allocation2 + $0x30] sm:$0xff]   ;;  %v833_v26 = vld [vmem:[#allocation2 + $0x38] sm:$0xff]  }
  0x3e   :  { %736 = vmatpush3.bf16.msra.mxu1 %v827_v12  ;;  %v97_v30 = vld [vmem:[%s1187_s3] sm:$0x3]  ;;  %v835_v53 = vld [vmem:[#allocation6 + $0x8] sm:$0xff]   ;;  %v836_v55 = vld [vmem:[#allocation6 + $0x10] sm:$0xff]  }
  0x3f   :  { %737 = vmatprep.subr.bf16.mxu1 %v938_v1  ;;  %v102_v32 = vrot.slane %v97_v30, %v101_v29  ;;  %v106_v33 = vrot.slane %v97_v30, %v105_v31  ;;  %v834_v44 = vld [vmem:[#allocation6] sm:$0xff]   ;;  %v837_v56 = vld [vmem:[#allocation6 + $0x18] sm:$0xff]   ;;  %v245_v59 = vld [vmem:[%s1185_s1 + $0x8] sm:$0xff] }
  0x40   :  { %200 = vmatpush1.bf16.msra.mxu0 %v809_v7  ;;  %v244_v57 = vld [vmem:[%s1185_s1] sm:$0xff]  ;;  %v839_v7 = vld [vmem:[#allocation6 + $0x28] sm:$0xff]  }
  0x41   :  { %201 = vmatprep.subr.bf16.mxu0 %v810_v8  ;;  %v838_v63 = vld [vmem:[#allocation6 + $0x20] sm:$0xff]   ;;  %v843_v12 = vld [vmem:[#allocation4 + $0x8] sm:$0xff]  }
  0x42   :  { %738 = vmatpush3.bf16.msra.mxu1 %v828_v17  ;;  %v842_v11 = vld [vmem:[#allocation4] sm:$0xff]   ;;  %v848_v17 = vld [vmem:[#allocation4 + $0x30] sm:$0xff]  }
  0x43   :  { %739 = vmatprep.subr.bf16.mxu1 %v938_v1 }
  0x44   :  { %202 = vmatpush1.bf16.msra.mxu0 %v812_v9  ;;  %v840_v9 = vld [vmem:[#allocation6 + $0x30] sm:$0xff]  }
  0x45   :  { %203 = vmatprep.subr.bf16.mxu0 %v813_v10  ;;  %v841_v10 = vld [vmem:[#allocation6 + $0x38] sm:$0xff]  }
  0x46   :  { %740 = vmatpush3.bf16.msra.mxu1 %v829_v18  ;;  %v849_v18 = vld [vmem:[#allocation4 + $0x38] sm:$0xff]  }
  0x47   :  { %741 = vmatprep.subr.bf16.mxu1 %v938_v1 }
  0x48   :  { %204 = vmatpush1.bf16.msra.mxu0 %v815_v13  ;;  %v844_v13 = vld [vmem:[#allocation4 + $0x10] sm:$0xff]  }
  0x49   :  { %205 = vmatprep.subr.bf16.mxu0 %v816_v14  ;;  %v845_v14 = vld [vmem:[#allocation4 + $0x18] sm:$0xff]  }
  0x4a   :  { %742 = vmatpush3.bf16.msra.mxu1 %v830_v21 }
  0x4b   :  { %743 = vmatprep.subr.bf16.mxu1 %v938_v1 }
  0x4c   :  { %206 = vmatpush1.bf16.msra.mxu0 %v818_v15  ;;  %v846_v15 = vld [vmem:[#allocation4 + $0x20] sm:$0xff]  }
  0x4d   :  { %207 = vmatprep.subr.bf16.mxu0 %v819_v16  ;;  %v847_v16 = vld [vmem:[#allocation4 + $0x28] sm:$0xff]  }
  0x4e   :  { %744 = vmatpush3.bf16.msra.mxu1 %v831_v24 }
  0x4f   :  { %745 = vmatprep.subr.bf16.mxu1 %v938_v1 }
  0x50   :  { %208 = vmatpush1.bf16.msra.mxu0 %v821_v19 }
  0x51   :  { %209 = vmatprep.subr.bf16.mxu0 %v822_v20 }
  0x52   :  { %746 = vmatpush3.bf16.msra.mxu1 %v832_v25 }
  0x53   :  { %747 = vmatprep.subr.bf16.mxu1 %v938_v1 }
  0x54   :  { %210 = vmatpush1.bf16.msra.mxu0 %v824_v22 }
  0x55   :  { %753 = vmatprep.subr.bf16.mxu0 %v938_v1 }
  0x56   :  { %748 = vmatpush3.bf16.msra.mxu1 %v833_v26 }
  0x57   :  { %228 = vmatmul.mubr.bf16.vlgmr.msra.gmra.mrb[0].mxu0 %v825_v23  ;;  %773 = vmatprep.subr.bf16.mxu1 %v938_v1  ;;  %v668_v23 = vld [vmem:[%s1189_s5] ss:$0 sm:$0xff] }
  0x58   :  { %769 = vmatprep.mubr.msk.bf16.mxu0 %vm939_vm0, %v938_v1  ;;  %754 = vmatpush3.bf16.msra.mxu0 %v842_v11 }
  0x59   :  { %755 = vmatprep.subr.bf16.mxu0 %v938_v1 }
  0x5c   :  { %756 = vmatpush3.bf16.msra.mxu0 %v843_v12 }
  0x5d   :  { %757 = vmatprep.subr.bf16.mxu0 %v938_v1 }
  0x60   :  { %758 = vmatpush3.bf16.msra.mxu0 %v844_v13 }
  0x61   :  { %759 = vmatprep.subr.bf16.mxu0 %v938_v1 }
  0x64   :  { %760 = vmatpush3.bf16.msra.mxu0 %v845_v14 }
  0x65   :  { %761 = vmatprep.subr.bf16.mxu0 %v938_v1 }
  0x68   :  { %762 = vmatpush3.bf16.msra.mxu0 %v846_v15 }
  0x69   :  { %763 = vmatprep.subr.bf16.mxu0 %v938_v1 }
  0x6c   :  { %764 = vmatpush3.bf16.msra.mxu0 %v847_v16 }
  0x6d   :  { %765 = vmatprep.subr.bf16.mxu0 %v938_v1 }
  0x70   :  { %766 = vmatpush3.bf16.msra.mxu0 %v848_v17 }
  0x71   :  { %767 = vmatprep.subr.bf16.mxu0 %v938_v1 }
  0x74   :  { %768 = vmatpush3.bf16.msra.mxu0 %v849_v18 }
 0x12a   :  { %v229_v34 = vpop.f32.mrb[0].mxu0 }
 0x12b   :  { %v230_v35 = vadd.f32 %v229_v34, %v102_v32  ;;  %v231_v36 = vpop.f32.mrb[1].mxu0 }
 0x12c   :  { %v232_v37 = vadd.f32 %v231_v36, %v106_v33  ;;  %v233_v38 = vpop.f32.mrb[2].mxu0 }
 0x12d   :  { %621 = vst [vmem:[%s1194_s10] sm:$0xff] %v230_v35  ;;  %v234_v39 = vadd.f32 %v233_v38, %v102_v32  ;;  %v235_v40 = vpop.f32.mrb[3].mxu0  ;;  %v252_v41 = vmul.f32 %v230_v35, %v230_v35  ;;  %v688_v32 = vld [vmem:[%s1193_s9] ss:$0 sm:$0xff] }
 0x12e   :  { %v238_v42 = vmul.f32 0.5, %v232_v37  ;;  %622 = vst [vmem:[%s1194_s10 + $0x8] sm:$0xff] %v232_v37  ;;  %v236_v43 = vadd.f32 %v235_v40, %v106_v33  ;;  %v250_v45 = vadd.f32 1.0, %v232_v37 }
 0x12f   :  { %623 = vst [vmem:[%s1194_s10 + $0x28] sm:$0xff] %v234_v39  ;;  %v266_v46 = vpack.c.bf16 %v234_v39, %v230_v35  ;;  %v253_v47 = vmul.f32 %v234_v39, %v234_v39 }
 0x130   :  { %v240_v48 = vmul.f32 1.442695, %v238_v42  ;;  %v239_v49 = vmul.f32 0.5, %v236_v43  ;;  %v251_v50 = vadd.f32 1.0, %v236_v43  ;;  %624 = vst [vmem:[%s1194_s10 + $0x30] sm:$0xff] %v236_v43  ;;  %v254_v51 = vsub.f32 %v250_v45, %v252_v41 }
 0x131   :  { %750 = vmatmul.mubr.bf16.vlgmr.msra.gmra.mrb[0].mxu1 %v266_v46  ;;  %v677_v42 = vld [vmem:[%s1191_s7] ss:$0 sm:$0xff] }
 0x132   :  { %850 = vpow2.f32 %v240_v48  ;;  %v242_v52 = vmul.f32 1.442695, %v239_v49  ;;  %774 = vmatpush3.bf16.msra.mxu1 %v834_v44  ;;  %v255_v54 = vsub.f32 %v251_v50, %v253_v47  ;;  %789 = vmatprep.mubr.msk.bf16.mxu1 %vm939_vm0, %v938_v1 }
 0x133   :  { %775 = vmatprep.subr.bf16.mxu1 %v938_v1 }
 0x134   :  { %852 = vpow2.f32 %v242_v52 }
 0x136   :  { %776 = vmatpush3.bf16.msra.mxu1 %v835_v53 }
 0x137   :  { %777 = vmatprep.subr.bf16.mxu1 %v938_v1 }
 0x13a   :  { %778 = vmatpush3.bf16.msra.mxu1 %v836_v55 }
 0x13b   :  { %779 = vmatprep.subr.bf16.mxu1 %v938_v1 }
 0x13c   :  { %v851_v58 = vpop.eup %850 }
 0x13d   :  { %v256_v60 = vmul.f32 %v851_v58, %v851_v58  ;;  %v246_v61 = vmul.f32 %v851_v58, %v244_v57 }
 0x13e   :  { %v853_v62 = vpop.eup %852  ;;  %780 = vmatpush3.bf16.msra.mxu1 %v837_v56 }
 0x13f   :  { %781 = vmatprep.subr.bf16.mxu1 %v938_v1  ;;  %v258_v0 = vsub.f32 %v254_v51, %v256_v60  ;;  %v257_v2 = vmul.f32 %v853_v62, %v853_v62  ;;  %v247_v3 = vmul.f32 %v853_v62, %v245_v59  ;;  %v248_v4 = vadd.f32 %v246_v61, %v230_v35 }
 0x141   :  { %260 = vadd.xlane.f32.xlu0 %v258_v0  ;;  %v259_v5 = vsub.f32 %v255_v54, %v257_v2  ;;  %v249_v6 = vadd.f32 %v247_v3, %v234_v39  ;;  %625 = vst [vmem:[%s1194_s10 + $0x10] sm:$0xff] %v248_v4 }
 0x142   :  { %782 = vmatpush3.bf16.msra.mxu1 %v838_v63 }
 0x143   :  { %783 = vmatprep.subr.bf16.mxu1 %v938_v1  ;;  %v506_v8 = vpack.c.bf16 %v249_v6, %v248_v4  ;;  %626 = vst [vmem:[%s1194_s10 + $0x38] sm:$0xff] %v249_v6 }
 0x145   :  { %262 = vadd.xlane.f32.xlu0 %v259_v5 }
 0x146   :  { %784 = vmatpush3.bf16.msra.mxu1 %v839_v7 }
 0x147   :  { %785 = vmatprep.subr.bf16.mxu1 %v938_v1 }
 0x14a   :  { %786 = vmatpush3.bf16.msra.mxu1 %v840_v9 }
 0x14b   :  { %787 = vmatprep.subr.bf16.mxu1 %v938_v1 }
 0x14e   :  { %788 = vmatpush3.bf16.msra.mxu1 %v841_v10 }
 0x151   :  { %790 = vmatmul.mubr.bf16.vlgmr.msra.gmra.mrb[4].mxu1 %v506_v8 }
 0x1ce   :  { %v261_v19 = vpop.xlane.xlu0 %260 }
 0x1cf   :  { %v264_v20 = vmul.f32 -0.5, %v261_v19 }
 0x1d1   :  { %627 = vst [vmem:[%s1194_s10 + $0x18] sm:$0xff] %v264_v20 }
 0x1d2   :  { %v263_v21 = vpop.xlane.xlu0 %262 }
 0x1d3   :  { %v265_v22 = vmul.f32 -0.5, %v263_v21 }
 0x1d5   :  { %628 = vst [vmem:[%s1194_s10 + $0x40] sm:$0xff] %v265_v22 }
 0x204   :  { %v372_v24 = vpop.f32.mrb[0].mxu1 }
 0x205   :  { %v373_v1 = vadd.f32 %v668_v23, %v372_v24  ;;  %v751_v25 = vpop.f32.mrb[1].mxu1 }
 0x206   :  { %v375_v26 = vpop.f32.mrb[2].mxu1 }
 0x207   :  { %v376_v27 = vadd.f32 %v668_v23, %v375_v26  ;;  %v752_v28 = vpop.f32.mrb[3].mxu1  ;;  %v379_v29 = vmax.f32 %v373_v1, 0.0 }
 0x209   :  { %v380_v30 = vmax.f32 %v376_v27, 0.0 }
 0x20b   :  { %v381_v31 = vpack.c.bf16 %v380_v30, %v379_v29 }
 0x20d   :  { %770 = vmatmul.mubr.bf16.vlgmr.msra.gmra.mrb[4].mxu0 %v381_v31 }
 0x224   :  { %v612_v33 = vpop.f32.mrb[4].mxu1 }
 0x225   :  { %v613_v34 = vadd.f32 %v688_v32, %v612_v33  ;;  %v791_v35 = vpop.f32.mrb[5].mxu1 }
 0x226   :  { %v615_v36 = vpop.f32.mrb[6].mxu1 }
 0x227   :  { %v616_v37 = vadd.f32 %v688_v32, %v615_v36  ;;  %v792_v38 = vpop.f32.mrb[7].mxu1  ;;  %v619_v39 = vmax.f32 %v613_v34, 0.0 }
 0x229   :  { %v620_v40 = vmax.f32 %v616_v37, 0.0 }
 0x22b   :  { %v704_v41 = vpack.c.bf16 %v620_v40, %v619_v39 }
 0x22d   :  { %705 = vst [vmem:[%s1195_s11] sm:$0xff] %v704_v41  }
 0x2e0   :  { %v487_v43 = vpop.f32.mrb[4].mxu0 }
 0x2e1   :  { %v488_v44 = vadd.f32 %v677_v42, %v487_v43  ;;  %v771_v45 = vpop.f32.mrb[5].mxu0 }
 0x2e2   :  { %v490_v46 = vpop.f32.mrb[6].mxu0 }
 0x2e3   :  { %v686_v47 = vmul.f32 -1.442695, %v488_v44  ;;  %v491_v48 = vadd.f32 %v677_v42, %v490_v46  ;;  %v772_v49 = vpop.f32.mrb[7].mxu0 }
 0x2e5   :  { %854 = vpow2.f32 %v686_v47  ;;  %v687_v50 = vmul.f32 -1.442695, %v491_v48 }
 0x2e7   :  { %856 = vpow2.f32 %v687_v50 }
 0x2ef   :  { %v855_v51 = vpop.eup %854 }
 0x2f0   :  { %v500_v52 = vadd.f32 1.0, %v855_v51 }
 0x2f1   :  { %v857_v53 = vpop.eup %856 }
 0x2f2   :  { %858 = vrcp.f32 %v500_v52  ;;  %v501_v54 = vadd.f32 1.0, %v857_v53 }
 0x2f4   :  { %860 = vrcp.f32 %v501_v54 }
 0x2fc   :  { %v859_v55 = vpop.eup %858 }
 0x2fd   :  { %629 = vst [vmem:[%s1194_s10 + $0x20] sm:$0xff] %v859_v55 }
 0x2fe   :  { %v861_v56 = vpop.eup %860 }
 0x2ff   :  { %630 = vst [vmem:[%s1194_s10 + $0x48] sm:$0xff] %v861_v56 }
 0x300   :  { %649 = vsyncpa [#allocation3], 1 }
 0x301   :  { %650 = vsyncpa [#allocation5], 1 }

</bundles_post_ra>
